<compile_context>
chip_gen: v5e
topology: v5e:2x2
jax: 0.10.0
libtpu: 0.0.40
codegen_flags: <defaults>
</compile_context>

<pallas_src>
import functools
import math

import jax
import jax.numpy as jnp
from jax.experimental import pallas as pl
from jax.experimental.pallas import tpu as pltpu

MIN_NORM = 1e-15
CURV = 1.0  # PoincareBall default curvature c


def _round_up(n, m):
    return ((n + m - 1) // m) * m


# ---------------------------------------------------------------------------
# Pallas kernel
# ---------------------------------------------------------------------------
def geodesic_kernel(x_ref, w_ref, s_ref, o_ref, *, to):
    c = CURV
    sqrt_c = math.sqrt(c)

    x = x_ref[...]                                       # (tb, D) f32
    xx = jnp.sum(x * x, axis=-1, keepdims=True)          # (tb, 1)  f32

    # One fused MXU matmul against the [p_tile | a_tile] weight slab (bf16 in, f32 out).
    xw = jnp.dot(x.astype(w_ref.dtype), w_ref[...],
                 preferred_element_type=jnp.float32)     # (tb, 2*to)
    px = xw[:, :to]                                      # <x, p_o>
    xa = xw[:, to:]                                      # <x, a_o>

    # Per-output constants, precomputed once at pack time (hoisted reductions).
    pp = s_ref[0:1, :]                                   # |p_o|^2      (1, to)
    pa = s_ref[1:2, :]                                   # <p_o, a_o>   (1, to)
    a_norm = s_ref[2:3, :]                               # |a_o| (clamped)

    # mobius_add(-p, x) = -alpha*p + beta*x   (geoopt denominator clamp included)
    t = 1.0 - 2.0 * c * px
    den_ma = jnp.maximum(t + (c * c) * pp * xx, MIN_NORM)
    inv_den_ma = pl.reciprocal(den_ma, approx=False)
    alpha = (t + c * xx) * inv_den_ma
    beta = (1.0 - c * pp) * inv_den_ma

    # |diff|^2 via the expanded quadratic (absolute error O(eps); it only enters
    # additively in the denominator below).
    diff_norm2 = jnp.maximum(
        alpha * alpha * pp - 2.0 * alpha * beta * px + beta * beta * xx, MIN_NORM)
    sc_diff_a = beta * xa - alpha * pa                   # signed=True -> no abs

    num = 2.0 * sqrt_c * sc_diff_a
    den = jnp.maximum((1.0 - c * diff_norm2) * a_norm, MIN_NORM)
    z = num * pl.reciprocal(den, approx=False)
    # arsinh with the same MIN_NORM clamp as the pvae Arsinh autograd fn
    res = jnp.log(jnp.maximum(z + jnp.sqrt(1.0 + z * z), MIN_NORM)) / sqrt_c
    # weight_norm=False -> no * a_norm scaling
    o_ref[...] = res.astype(o_ref.dtype)


# ---------------------------------------------------------------------------
# Init-time packing: transpose / pad / interleave weights and hoist reductions.
# Done ONCE per layer, not per forward call.
# ---------------------------------------------------------------------------
def prepare_geodesic_params(p, a, *, to=512, mxu_dtype=jnp.bfloat16):
    """p: (O, D) weight, a: (O, D) bias -> packed params dict."""
    O, D = p.shape
    assert a.shape == (O, D)

    O_pad = _round_up(O, 128)                     # lane-dense output width
    to = max(128, min(to, O_pad))
    to = (to // 128) * 128
    # keep the double-buffered weight slab tile below ~8 MiB even for very large D
    itemsize = jnp.dtype(mxu_dtype).itemsize
    while to > 128 and 2 * (D * 2 * to * itemsize) > (8 << 20):
        to //= 2
    n_tiles = pl.cdiv(O_pad, to)
    O_pad = n_tiles * to

    pt = jnp.zeros((D, O_pad), jnp.float32).at[:, :O].set(
        jnp.transpose(p).astype(jnp.float32))
    at = jnp.zeros((D, O_pad), jnp.float32).at[:, :O].set(
        jnp.transpose(a).astype(jnp.float32))

    # Hoisted per-output reductions (f32): |p|^2, <p,a>, |a|.
    pp = jnp.sum(pt * pt, axis=0)
    pa = jnp.sum(pt * at, axis=0)
    a_norm = jnp.maximum(jnp.sqrt(jnp.sum(at * at, axis=0)), MIN_NORM)
    stats = jnp.concatenate(
        [jnp.stack([pp, pa, a_norm], axis=0), jnp.zeros((5, O_pad), jnp.float32)],
        axis=0)                                   # (8, O_pad) f32 (sublane-aligned)

    # Tile-interleaved fused slab: columns = [pt_tile0 | at_tile0 | pt_tile1 | at_tile1 | ...]
    # so each output tile j is one contiguous (D, 2*to) block -> one matmul per tile.
    slab = jnp.concatenate(
        [pt.reshape(D, n_tiles, to), at.reshape(D, n_tiles, to)], axis=-1
    ).reshape(D, 2 * O_pad).astype(mxu_dtype)

    return dict(slab=slab, stats=stats, out_features=O, o_pad=O_pad, to=to, d=D)


# ---------------------------------------------------------------------------
# Forward wrapper
# ---------------------------------------------------------------------------
def geodesic_layer(x, params, *, tb=512, vmem_budget=24 << 20):
    """x: (B, D_in) f32, params from prepare_geodesic_params -> (B, O)."""
    B, D = x.shape
    assert D == params["d"]
    O, O_pad, to = params["out_features"], params["o_pad"], params["to"]
    slab, stats = params["slab"], params["stats"]
    slab_itemsize = jnp.dtype(slab.dtype).itemsize

    tb_eff = max(8, (min(tb, _round_up(B, 8)) // 8) * 8)

    def vmem_estimate(tbx):
        # double-buffered x, slab, stats, out tiles (f32 except slab)
        return 2 * (tbx * D * 4 + D * 2 * to * slab_itemsize + 8 * to * 4 + tbx * to * 4)

    while tb_eff > 8 and vmem_estimate(tb_eff) > vmem_budget:
        tb_eff = max(8, (tb_eff // 2 // 8) * 8)

    Bp = _round_up(B, tb_eff)
    x_f32 = x.astype(jnp.float32)
    if Bp != B:
        x_f32 = jnp.zeros((Bp, D), jnp.float32).at[:B].set(x_f32)

    n_bt = Bp // tb_eff
    n_ot = O_pad // to
    kernel = functools.partial(geodesic_kernel, to=to)

    out = pl.pallas_call(
        kernel,
        out_shape=jax.ShapeDtypeStruct((Bp, O_pad), jnp.float32),
        grid_spec=pltpu.PrefetchScalarGridSpec(
            num_scalar_prefetch=0,
            grid=(n_bt, n_ot),
            in_specs=[
                pl.BlockSpec((tb_eff, D), lambda i, j: (i, 0)),     # x tile (fetched once per i)
                pl.BlockSpec((D, 2 * to), lambda i, j: (0, j)),     # fused [p|a] weight tile
                pl.BlockSpec((8, to), lambda i, j: (0, j)),         # hoisted per-output stats
            ],
            out_specs=pl.BlockSpec((tb_eff, to), lambda i, j: (i, j)),
        ),
        compiler_params=pltpu.CompilerParams(
            dimension_semantics=("parallel", "parallel")),
    )(x_f32, slab, stats)
    return out[:B, :O]


# ---------------------------------------------------------------------------
# Parameter construction (deterministic, mirrors RiemannianLayer.__init__)
# ---------------------------------------------------------------------------
def make_params(key, in_features, out_features, c=CURV):
    k1, k2 = jax.random.split(key)
    fan_in = in_features
    # kaiming_normal_(a=sqrt(5)) -> std = sqrt(2/(1+5)) / sqrt(fan_in)
    std = math.sqrt(2.0 / 6.0) / math.sqrt(fan_in)
    _weight = std * jax.random.normal(k1, (out_features, in_features), jnp.float32)
    bound = 4.0 / math.sqrt(fan_in)
    _bias = jax.random.uniform(k2, (out_features, 1), jnp.float32, -bound, bound)

    sqrt_c = math.sqrt(c)
    # bias = expmap0(_weight * _bias)
    u = _weight * _bias
    u_norm = jnp.maximum(jnp.sqrt(jnp.sum(u * u, axis=-1, keepdims=True)), MIN_NORM)
    bias = jnp.tanh(sqrt_c * u_norm) * u / (sqrt_c * u_norm)
    # weight = transp0(bias, _weight) = _weight * clamp(1 - c*|bias|^2, MIN_NORM)
    weight = _weight * jnp.maximum(
        1.0 - c * jnp.sum(bias * bias, axis=-1, keepdims=True), MIN_NORM)
    return weight, bias


# ---------------------------------------------------------------------------
# Pure-JAX reference (explicit mobius_add path) for validation
# ---------------------------------------------------------------------------
def geodesic_ref(x, p, a, c=CURV):
    sqrt_c = math.sqrt(c)
    xB = x[:, None, :]          # (B, 1, D)
    mp = -p[None, :, :]         # (1, O, D)
    aO = a[None, :, :]
    x2 = jnp.sum(mp * mp, -1, keepdims=True)
    y2 = jnp.sum(xB * xB, -1, keepdims=True)
    xy = jnp.sum(mp * xB, -1, keepdims=True)
    num = (1 + 2 * c * xy + c * y2) * mp + (1 - c * x2) * xB
    den = jnp.maximum(1 + 2 * c * xy + c * c * x2 * y2, MIN_NORM)
    diff = num / den
    diff_norm2 = jnp.maximum(jnp.sum(diff * diff, -1), MIN_NORM)
    sc = jnp.sum(diff * aO, -1)
    a_norm = jnp.maximum(jnp.sqrt(jnp.sum(a * a, -1)), MIN_NORM)[None, :]
    z = (2 * sqrt_c * sc) / jnp.maximum((1 - c * diff_norm2) * a_norm, MIN_NORM)
    return jnp.log(jnp.maximum(z + jnp.sqrt(1 + z * z), MIN_NORM)) / sqrt_c


if __name__ == "__main__":
    B, D_IN, D_OUT = 8, 32, 16
    key = jax.random.PRNGKey(0)
    kx, kp = jax.random.split(key)

    # input points inside the unit Poincare ball
    x = jax.random.uniform(kx, (B, D_IN), jnp.float32, minval=-0.1, maxval=0.1)
    weight, bias = make_params(kp, D_IN, D_OUT)
    ref = geodesic_ref(x, weight, bias)

    # f32 MXU path: exactness check against the explicit-Mobius reference.
    params_f32 = prepare_geodesic_params(weight, bias, mxu_dtype=jnp.float32)
    out_f32 = jax.block_until_ready(geodesic_layer(x, params_f32))
    assert out_f32.shape == (B, D_OUT)
    assert jnp.allclose(out_f32, ref, rtol=1e-4, atol=1e-4), (
        float(jnp.max(jnp.abs(out_f32 - ref))))

    # bf16 MXU path (default / fast): f32 accumulation, looser tolerance.
    params_bf16 = prepare_geodesic_params(weight, bias)
    out_bf16 = jax.block_until_ready(geodesic_layer(x, params_bf16))
    assert out_bf16.shape == (B, D_OUT)
    assert jnp.allclose(out_bf16, ref, rtol=1e-2, atol=1e-2), (
        float(jnp.max(jnp.abs(out_bf16 - ref))))

    print("KERNEL_OK")
</pallas_src>

<mosaic_0001>
module attributes {stable_mosaic.version = 11 : i64} {
  func.func @geodesic_kernel(%arg0: i32, %arg1: i32, %arg2: memref<8x32xf32, #tpu.memory_space<vmem>>, %arg3: memref<32x256xf32, #tpu.memory_space<vmem>>, %arg4: memref<8x128xf32, #tpu.memory_space<vmem>>, %arg5: memref<8x128xf32, #tpu.memory_space<vmem>>) attributes {dimension_semantics = [#tpu.dimension_semantics<parallel>, #tpu.dimension_semantics<parallel>], iteration_bounds = array<i64: 1, 1>, scalar_prefetch = 0 : i64, scratch_operands = 0 : i64, tpu.core_type = #tpu.core_type<tc>, window_params = [{transform_indices = @transform_0, window_bounds = array<i64: 8, 32>}, {transform_indices = @transform_1, window_bounds = array<i64: 32, 256>}, {transform_indices = @transform_2, window_bounds = array<i64: 8, 128>}, {transform_indices = @transform_3, window_bounds = array<i64: 8, 128>}]} {
    %c0 = arith.constant 0 : index
    %c0_0 = arith.constant 0 : index
    %0 = vector.load %arg2[%c0, %c0_0] : memref<8x32xf32, #tpu.memory_space<vmem>>, vector<8x32xf32>
    %1 = arith.mulf %0, %0 : vector<8x32xf32>
    %cst = arith.constant dense<0.000000e+00> : vector<8xf32>
    %2 = vector.multi_reduction <add>, %1, %cst [1] : vector<8x32xf32> to vector<8xf32>
    %3 = vector.shape_cast %2 : vector<8xf32> to vector<8x1xf32>
    %c0_1 = arith.constant 0 : index
    %c0_2 = arith.constant 0 : index
    %4 = vector.load %arg3[%c0_1, %c0_2] : memref<32x256xf32, #tpu.memory_space<vmem>>, vector<32x256xf32>
    %cst_3 = arith.constant dense<0.000000e+00> : vector<8x256xf32>
    %5 = tpu.matmul %0, %4, %cst_3 {dimension_numbers = #tpu.dot_dimension_numbers<[1], [0], [0], [1], [0, 0, 1, 1], [], []>} : vector<8x32xf32>, vector<32x256xf32>, vector<8x256xf32> -> vector<8x256xf32>
    %6 = vector.extract_strided_slice %5 {offsets = [0, 0], sizes = [8, 128], strides = [1, 1]} : vector<8x256xf32> to vector<8x128xf32>
    %7 = vector.extract_strided_slice %5 {offsets = [0, 128], sizes = [8, 128], strides = [1, 1]} : vector<8x256xf32> to vector<8x128xf32>
    %c0_4 = arith.constant 0 : index
    %c0_5 = arith.constant 0 : index
    %8 = vector.load %arg4[%c0_4, %c0_5] : memref<8x128xf32, #tpu.memory_space<vmem>>, vector<1x128xf32>
    %c1 = arith.constant 1 : index
    %c0_6 = arith.constant 0 : index
    %9 = vector.load %arg4[%c1, %c0_6] : memref<8x128xf32, #tpu.memory_space<vmem>>, vector<1x128xf32>
    %c2 = arith.constant 2 : index
    %c0_7 = arith.constant 0 : index
    %10 = vector.load %arg4[%c2, %c0_7] : memref<8x128xf32, #tpu.memory_space<vmem>>, vector<1x128xf32>
    %cst_8 = arith.constant 2.000000e+00 : f32
    %11 = vector.broadcast %cst_8 : f32 to vector<8x128xf32>
    %12 = arith.mulf %11, %6 : vector<8x128xf32>
    %cst_9 = arith.constant 1.000000e+00 : f32
    %13 = vector.broadcast %cst_9 : f32 to vector<8x128xf32>
    %14 = arith.subf %13, %12 : vector<8x128xf32>
    %cst_10 = arith.constant 1.000000e+00 : f32
    %15 = vector.broadcast %cst_10 : f32 to vector<1x128xf32>
    %16 = arith.mulf %15, %8 : vector<1x128xf32>
    %17 = vector.broadcast %16 : vector<1x128xf32> to vector<8x128xf32>
    %18 = vector.broadcast %3 : vector<8x1xf32> to vector<8x128xf32>
    %19 = arith.mulf %17, %18 : vector<8x128xf32>
    %20 = arith.addf %14, %19 : vector<8x128xf32>
    %cst_11 = arith.constant 1.000000e-15 : f32
    %21 = vector.broadcast %cst_11 : f32 to vector<8x128xf32>
    %22 = arith.maximumf %20, %21 : vector<8x128xf32>
    %23 = tpu.reciprocal %22 : vector<8x128xf32> -> vector<8x128xf32>
    %cst_12 = arith.constant 1.000000e+00 : f32
    %24 = vector.broadcast %cst_12 : f32 to vector<8x1xf32>
    %25 = arith.mulf %24, %3 : vector<8x1xf32>
    %26 = vector.broadcast %25 : vector<8x1xf32> to vector<8x128xf32>
    %27 = arith.addf %14, %26 : vector<8x128xf32>
    %28 = arith.mulf %27, %23 : vector<8x128xf32>
    %cst_13 = arith.constant 1.000000e+00 : f32
    %29 = vector.broadcast %cst_13 : f32 to vector<1x128xf32>
    %30 = arith.mulf %29, %8 : vector<1x128xf32>
    %cst_14 = arith.constant 1.000000e+00 : f32
    %31 = vector.broadcast %cst_14 : f32 to vector<1x128xf32>
    %32 = arith.subf %31, %30 : vector<1x128xf32>
    %33 = vector.broadcast %32 : vector<1x128xf32> to vector<8x128xf32>
    %34 = arith.mulf %33, %23 : vector<8x128xf32>
    %35 = arith.mulf %28, %28 : vector<8x128xf32>
    %36 = vector.broadcast %8 : vector<1x128xf32> to vector<8x128xf32>
    %37 = arith.mulf %35, %36 : vector<8x128xf32>
    %cst_15 = arith.constant 2.000000e+00 : f32
    %38 = vector.broadcast %cst_15 : f32 to vector<8x128xf32>
    %39 = arith.mulf %38, %28 : vector<8x128xf32>
    %40 = arith.mulf %39, %34 : vector<8x128xf32>
    %41 = arith.mulf %40, %6 : vector<8x128xf32>
    %42 = arith.subf %37, %41 : vector<8x128xf32>
    %43 = arith.mulf %34, %34 : vector<8x128xf32>
    %44 = vector.broadcast %3 : vector<8x1xf32> to vector<8x128xf32>
    %45 = arith.mulf %43, %44 : vector<8x128xf32>
    %46 = arith.addf %42, %45 : vector<8x128xf32>
    %cst_16 = arith.constant 1.000000e-15 : f32
    %47 = vector.broadcast %cst_16 : f32 to vector<8x128xf32>
    %48 = arith.maximumf %46, %47 : vector<8x128xf32>
    %49 = arith.mulf %34, %7 : vector<8x128xf32>
    %50 = vector.broadcast %9 : vector<1x128xf32> to vector<8x128xf32>
    %51 = arith.mulf %28, %50 : vector<8x128xf32>
    %52 = arith.subf %49, %51 : vector<8x128xf32>
    %cst_17 = arith.constant 2.000000e+00 : f32
    %53 = vector.broadcast %cst_17 : f32 to vector<8x128xf32>
    %54 = arith.mulf %53, %52 : vector<8x128xf32>
    %cst_18 = arith.constant 1.000000e+00 : f32
    %55 = vector.broadcast %cst_18 : f32 to vector<8x128xf32>
    %56 = arith.mulf %55, %48 : vector<8x128xf32>
    %cst_19 = arith.constant 1.000000e+00 : f32
    %57 = vector.broadcast %cst_19 : f32 to vector<8x128xf32>
    %58 = arith.subf %57, %56 : vector<8x128xf32>
    %59 = vector.broadcast %10 : vector<1x128xf32> to vector<8x128xf32>
    %60 = arith.mulf %58, %59 : vector<8x128xf32>
    %cst_20 = arith.constant 1.000000e-15 : f32
    %61 = vector.broadcast %cst_20 : f32 to vector<8x128xf32>
    %62 = arith.maximumf %60, %61 : vector<8x128xf32>
    %63 = tpu.reciprocal %62 : vector<8x128xf32> -> vector<8x128xf32>
    %64 = arith.mulf %54, %63 : vector<8x128xf32>
    %65 = arith.mulf %64, %64 : vector<8x128xf32>
    %cst_21 = arith.constant 1.000000e+00 : f32
    %66 = vector.broadcast %cst_21 : f32 to vector<8x128xf32>
    %67 = arith.addf %66, %65 : vector<8x128xf32>
    %68 = math.sqrt %67 : vector<8x128xf32>
    %69 = arith.addf %64, %68 : vector<8x128xf32>
    %cst_22 = arith.constant 1.000000e-15 : f32
    %70 = vector.broadcast %cst_22 : f32 to vector<8x128xf32>
    %71 = arith.maximumf %69, %70 : vector<8x128xf32>
    %72 = math.log %71 : vector<8x128xf32>
    %cst_23 = arith.constant 1.000000e+00 : f32
    %73 = vector.broadcast %cst_23 : f32 to vector<8x128xf32>
    %74 = arith.divf %72, %73 : vector<8x128xf32>
    %c0_24 = arith.constant 0 : index
    %c0_25 = arith.constant 0 : index
    %75 = vector.load %arg5[%c0_24, %c0_25] : memref<8x128xf32, #tpu.memory_space<vmem>>, vector<8x128xf32>
    tpu.vector_store %arg5[%c0_24, %c0_25], %74 {strides = array<i32>} : memref<8x128xf32, #tpu.memory_space<vmem>>, vector<8x128xf32>,
    return
  }
  func.func @transform_0(%arg0: i32, %arg1: i32) -> (i32, i32) {
    %c0_i32 = arith.constant 0 : i32
    %c0_i32_0 = arith.constant 0 : i32
    return %arg0, %c0_i32 : i32, i32
  }
  func.func @transform_1(%arg0: i32, %arg1: i32) -> (i32, i32) {
    %c0_i32 = arith.constant 0 : i32
    %c0_i32_0 = arith.constant 0 : i32
    return %c0_i32, %arg1 : i32, i32
  }
  func.func @transform_2(%arg0: i32, %arg1: i32) -> (i32, i32) {
    %c0_i32 = arith.constant 0 : i32
    %c0_i32_0 = arith.constant 0 : i32
    return %c0_i32, %arg1 : i32, i32
  }
  func.func @transform_3(%arg0: i32, %arg1: i32) -> (i32, i32) {
    %c0_i32 = arith.constant 0 : i32
    return %arg0, %arg1 : i32, i32
  }
}

</mosaic_0001>

<bundles_post_ra>
// kernel: tpu_custom_call.1
= control target key start
LH: loop header
LB: loop body
LE: loop exit
PB: predicated region body
PF: predicated region fallthrough
CT: control target
= control target key end

     0   :  { %8 = vsyncpa [#allocation3], 0  ;;  %s373_s0 = inlined_call_operand.hbm [shape: f32[8,32], index: 0, kind: input, shape index: {}]   ;;  %s374_s1 = inlined_call_operand.hbm [shape: f32[32,256], index: 1, kind: input, shape index: {}]   ;;  %s375_s2 = inlined_call_operand.hbm [shape: f32[8,128], index: 2, kind: input, shape index: {}]   ;;  %s376_s3 = inlined_call_operand.hbm [shape: f32[8,128], index: 3, kind: output, shape index: {}]  }
   0x1   :  { %9 = vsyncpa [#allocation6], 0  ;;  %s26_s14 = sshll.u32 %s374_s1, 4  ;;  %s27_s14 = int_to_ptr.hbm [resolvable:$true] %s26_s14 }
   0x2   :  { %10 = vsyncpa [#allocation4], 0  ;;  %s335_s15 = smov [#allocation5]   ;;  %s16_s19 = sshll.u32 %s373_s0, 4  ;;  %s17_s19 = int_to_ptr.hbm [resolvable:$true] %s16_s19 }
   0x3   :  { %s28_s16 = sshll.u32 %s335_s15, 4  ;;  %s336_s20 = smov 256   ;;  %s29_s16 = int_to_ptr.vmem [resolvable:$true] %s28_s16 }
   0x4   :  { %s337_s21 = smov 16   ;;  %s338_s22 = smov [#allocation2]  }
   0x5   :  { %34 = dma.hbm_to_vmem [thread:$0]  %s27_s14, 1024, %s29_s16, [#allocation6], %s336_s20, %s336_s20, %s337_s21  }
   0x6   :  { %s18_s23 = sshll.u32 %s338_s22, 4  ;;  %s40_s26 = sshll.u32 %s375_s2, 4  ;;  %s19_s23 = int_to_ptr.vmem [resolvable:$true] %s18_s23  ;;  %s41_s26 = int_to_ptr.hbm [resolvable:$true] %s40_s26 }
   0x7   :  { %21 = dma.hbm_to_vmem [thread:$0]  %s17_s19, 128, %s19_s23, [#allocation3]  }
   0x8   :  { %s339_s1 = smov [#allocation7]  }
   0x9   :  { %s42_s27 = sshll.u32 %s339_s1, 4  ;;  %s43_s27 = int_to_ptr.vmem [resolvable:$true] %s42_s27 }
   0xa   :  { %45 = dma.hbm_to_vmem [thread:$0]  %s41_s26, 128, %s43_s27, [#allocation6]  }
   0xb   :  { %329 = dma.done.wait [#allocation3], 128  }
   0xc   :  { %330 = vsyncadd [#allocation3], 4294967168 }
   0xd   :  { %331 = dma.done.wait [#allocation6], 1152  }
   0xe   :  { %332 = vsyncadd [#allocation6], 4294966144  ;;  %v70_v0 = vld [vmem:[#allocation5 + $0x30] sm:$0xff]  ;;  %v68_v1 = vld [vmem:[#allocation5 + $0x20] sm:$0xff]  ;;  %vm60_vm0 = vcmask 261120   ;;  %s340_s0 = smov [#allocation8]  }
   0xf   :  { %87 = vmatpush.msra.mxu0 %v70_v0  ;;  %v58_v2 = vld [vmem:[#allocation2] sm:$0xff]  ;;  %v66_v4 = vld [vmem:[#allocation5 + $0x10] sm:$0xff]  ;;  %v69_v6 = vld [vmem:[#allocation5 + $0x28] sm:$0xff]  ;;  %s201_s2 = sshll.u32 %s340_s0, 4  ;;  %s203_s30 = sshll.u32 %s376_s3, 4  ;;  %s202_s2 = int_to_ptr.vmem [resolvable:$true] %s201_s2  ;;  %s204_s30 = int_to_ptr.hbm [resolvable:$true] %s203_s30 }
  0x10   :  { %v71_v3 = vld [vmem:[#allocation5 + $0x38] sm:$0xff]  ;;  %v59_v5 = vmul.f32 %v58_v2, %v58_v2  ;;  %v64_v8 = vld [vmem:[#allocation5] sm:$0xff]  ;;  %v65_v10 = vld [vmem:[#allocation5 + $0x8] sm:$0xff] }
  0x11   :  { %107 = vmatpush.msra.mxu1 %v71_v3  ;;  %88 = vmatpush.msra.mxu0 %v68_v1  ;;  %v67_v7 = vld [vmem:[#allocation5 + $0x18] sm:$0xff]  ;;  %v222_v11 = vld [vmem:[#allocation7] ss:$0 sm:$0xff]  ;;  %v223_v45 = vld [vmem:[#allocation7 + $0x2] ss:$0 sm:$0xff] }
  0x12   :  { %v61_v9 = vsel %vm60_vm0, %v59_v5, 0.0  ;;  %v115_v20 = vld [vmem:[#allocation7] sm:$0x1]  ;;  %v224_v49 = vld [vmem:[#allocation7 + $0x1] ss:$0 sm:$0xff] }
  0x13   :  { %108 = vmatpush.msra.mxu1 %v69_v6  ;;  %89 = vmatpush.msra.mxu0 %v66_v4  ;;  %v140_v23 = vsub.f32 1.0, %v115_v20 }
  0x14   :  { %62 = vadd.xlane.f32.xlu0 %v61_v9 }
  0x15   :  { %109 = vmatpush.msra.mxu1 %v67_v7  ;;  %90 = vmatpush.msra.mxu0 %v64_v8  ;;  %v141_v28 = vperm.slane %v140_v23, 0 }
  0x16   :  { %214 = vmatmul.msk.f32.vlgmr.msra.gmra.mxu0 %vm60_vm0, %v58_v2 }
  0x17   :  { %110 = vmatpush.msra.mxu1 %v65_v10 }
  0x18   :  { %215 = vmatmul.msk.f32.vlgmr.msra.gmra.mxu1 %vm60_vm0, %v58_v2 }
  0x87   :  { %v63_v12 = vpop.xlane.xlu0 %62 }
  0x88   :  { %v121_v15 = vmul.f32 %v222_v11, %v63_v12 }
  0x93   :  { %v92_v13 = vpop.f32.mrf.mxu0 }
  0x94   :  { %v118_v14 = vmul.f32 2.0, %v92_v13 }
  0x95   :  { %v112_v50 = vpop.f32.mrf.mxu1 }
  0x96   :  { %v119_v16 = vsub.f32 1.0, %v118_v14 }
  0x98   :  { %v122_v17 = vadd.f32 %v121_v15, %v119_v16  ;;  %v138_v31 = vadd.f32 %v119_v16, %v63_v12 }
  0x9a   :  { %v123_v18 = vmax.f32 %v122_v17, 1e-15 }
  0x9c   :  { %225 = vrcp.f32 %v123_v18  ;;  %v135_v24 = vand.u32 2147483648, %v123_v18  ;;  %v133_v26 = vand.u32 2147483647, %v123_v18  ;;  %vm129_vm2 = vweird.f32 %v123_v18 }
  0x9e   :  { %v136_v29 = vor.u32 1.1754944e-38, %v135_v24  ;;  %vm134_vm4 = vcmp.eq.f32.partialorder %v133_v26, 8.507059e+37 }
  0xa2   :  { %v226_v19 = vpop.eup %225 }
  0xa3   :  { %v125_v21 = vmul.f32 %v226_v19, %v123_v18  ;;  %vm130_vm1 = vweird.f32 %v226_v19 }
  0xa4   :  { %vm131_vm3 = vmor %vm129_vm2, %vm130_vm1 }
  0xa5   :  { %v126_v22 = vsub.f32 1.0, %v125_v21 }
  0xa7   :  { %v127_v25 = vmul.f32 %v226_v19, %v126_v22 }
  0xa9   :  { %v128_v27 = vadd.f32 %v226_v19, %v127_v25 }
  0xab   :  { %v132_v30 = vsel %vm131_vm3, %v226_v19, %v128_v27 }
  0xac   :  { %v137_v32 = vsel %vm134_vm4, %v136_v29, %v132_v30 }
  0xad   :  { %v139_v33 = vmul.f32 %v138_v31, %v137_v32  ;;  %v142_v34 = vmul.f32 %v141_v28, %v137_v32 }
  0xaf   :  { %v143_v35 = vmul.f32 %v139_v33, %v139_v33  ;;  %v145_v36 = vmul.f32 2.0, %v139_v33  ;;  %v149_v38 = vmul.f32 %v142_v34, %v142_v34  ;;  %v153_v52 = vmul.f32 %v142_v34, %v112_v50 }
  0xb0   :  { %v155_v53 = vmul.f32 %v224_v49, %v139_v33 }
  0xb1   :  { %v146_v37 = vmul.f32 %v145_v36, %v142_v34  ;;  %v144_v39 = vmul.f32 %v222_v11, %v143_v35  ;;  %v150_v42 = vmul.f32 %v149_v38, %v63_v12 }
  0xb2   :  { %v156_v57 = vsub.f32 %v153_v52, %v155_v53 }
  0xb3   :  { %v147_v40 = vmul.f32 %v146_v37, %v92_v13 }
  0xb4   :  { %v157_v62 = vmul.f32 2.0, %v156_v57 }
  0xb5   :  { %v148_v41 = vsub.f32 %v144_v39, %v147_v40 }
  0xb7   :  { %v151_v43 = vadd.f32 %v150_v42, %v148_v41 }
  0xb9   :  { %v152_v44 = vmax.f32 %v151_v43, 1e-15 }
  0xbb   :  { %v158_v46 = vsub.f32 1.0, %v152_v44 }
  0xbd   :  { %v160_v47 = vmul.f32 %v223_v45, %v158_v46 }
  0xbf   :  { %v161_v48 = vmax.f32 %v160_v47, 1e-15 }
  0xc1   :  { %227 = vrcp.f32 %v161_v48  ;;  %v173_v56 = vand.u32 2147483648, %v161_v48  ;;  %v171_v59 = vand.u32 2147483647, %v161_v48  ;;  %vm167_vm6 = vweird.f32 %v161_v48 }
  0xc3   :  { %v174_v61 = vor.u32 1.1754944e-38, %v173_v56  ;;  %vm172_vm8 = vcmp.eq.f32.partialorder %v171_v59, 8.507059e+37 }
  0xc7   :  { %v228_v51 = vpop.eup %227 }
  0xc8   :  { %v163_v54 = vmul.f32 %v228_v51, %v161_v48  ;;  %vm168_vm5 = vweird.f32 %v228_v51 }
  0xc9   :  { %vm169_vm7 = vmor %vm167_vm6, %vm168_vm5 }
  0xca   :  { %v164_v55 = vsub.f32 1.0, %v163_v54 }
  0xcc   :  { %v165_v58 = vmul.f32 %v228_v51, %v164_v55 }
  0xce   :  { %v166_v60 = vadd.f32 %v228_v51, %v165_v58 }
  0xd0   :  { %v170_v63 = vsel %vm169_vm7, %v228_v51, %v166_v60 }
  0xd1   :  { %v175_v0 = vsel %vm172_vm8, %v174_v61, %v170_v63 }
  0xd2   :  { %v176_v1 = vmul.f32 %v175_v0, %v157_v62 }
  0xd4   :  { %v177_v2 = vmul.f32 %v176_v1, %v176_v1 }
  0xd6   :  { %v178_v3 = vadd.f32 1.0, %v177_v2 }
  0xd8   :  { %229 = vrsqrt.f32 %v178_v3  ;;  %vm186_vm9 = vcmp.eq.f32.partialorder %v178_v3, inf  ;;  %v189_v11 = vand.u32 2147483648, %v178_v3  ;;  %vm188_vm10 = vcmp.eq.f32.partialorder %v178_v3, 0.0 }
  0xde   :  { %v230_v4 = vpop.eup %229 }
  0xdf   :  { %v180_v5 = vmul.f32 %v230_v4, %v178_v3 }
  0xe1   :  { %v181_v6 = vmul.f32 %v230_v4, %v180_v5 }
  0xe3   :  { %v182_v7 = vmul.f32 0.5, %v181_v6 }
  0xe5   :  { %v183_v8 = vsub.f32 1.5, %v182_v7 }
  0xe7   :  { %v184_v9 = vmul.f32 %v230_v4, %v183_v8 }
  0xe9   :  { %v185_v10 = vmul.f32 %v184_v9, %v178_v3 }
  0xeb   :  { %v187_v12 = vsel %vm186_vm9, %v178_v3, %v185_v10 }
  0xec   :  { %v190_v13 = vsel %vm188_vm10, %v189_v11, %v187_v12 }
  0xed   :  { %v191_v14 = vadd.f32 %v190_v13, %v176_v1 }
  0xef   :  { %v192_v15 = vmax.f32 %v191_v14, 1e-15 }
  0xf1   :  { %231 = vlog2.f32 %v192_v15 }
  0xf7   :  { %v232_v16 = vpop.eup %231 }
  0xf8   :  { %v194_v17 = vmul.f32 0.6931472, %v232_v16 }
  0xfa   :  { %195 = vst [vmem:[#allocation8] sm:$0xff] %v194_v17 }
  0xfb   :  { %206 = dma.vmem_to_hbm [thread:$0]  %s202_s2, 128, %s204_s30, [#allocation4]  }
  0xfc   :  { %333 = dma.done.wait [#allocation4], 128  }
  0xfd   :  { %334 = vsyncadd [#allocation4], 4294967168 }
  0xfe   :  { %211 = vsyncpa [#allocation3], 1 }
  0xff   :  { %212 = vsyncpa [#allocation6], 1 }
 0x100   :  { %213 = vsyncpa [#allocation4], 1 }

</bundles_post_ra>
